<compile_context>
chip_gen: v7x
topology: tpu7x:2x2x1
jax: 0.10.0
libtpu: 0.0.40
codegen_flags: <defaults>
</compile_context>

<pallas_src>
import functools

import jax
import jax.numpy as jnp
from jax import lax
from jax.experimental import pallas as pl
from jax.experimental.pallas import tpu as pltpu


_SMALL_C = 8                      # memoize per-class exp slabs up to this many classes
_VMEM_WORKING_BUDGET = 24 << 20   # double-buffered input blocks + f32 temporaries
_VMEM_LIMIT_BYTES = 40 << 20      # explicit scoped-VMEM limit (OK on v5e/v6e/v7x)


def _sublane_tile(dtype):
    """Second-minor tiling granularity for a dtype: 8 (4B), 16 (2B), 32 (1B)."""
    return 8 * (4 // jnp.dtype(dtype).itemsize)


def _pick_tile_h(height, width, row_granularity, target_pixels):
    """Rows per tile: ~target_pixels pixels, a multiple of row_granularity, or full H."""
    rows = max(1, target_pixels // max(width, 1))
    if rows >= height:
        return height
    rows = max(row_granularity, (rows // row_granularity) * row_granularity)
    if rows >= height:
        return height
    return rows


def _fold_rows(a):
    """(th, W) f32 -> (min(th, 8), W) partial sums using only vreg-wise VPU adds."""
    th, w = a.shape
    if th <= 8:
        return a
    n_full = th // 8
    rem = th % 8
    if n_full > 1:
        # Splitting the sublane axis on an 8-row boundary is layout-preserving;
        # the leading-axis sum lowers to vreg + vreg adds (no XLU).
        folded = jnp.sum(a[:n_full * 8, :].reshape(n_full, 8, w), axis=0)
    else:
        folded = a[0:8, :]
    if rem:
        # Rare path (full-height tile with H % 8 != 0): add the ragged tail via a
        # select so rows already counted in the previous group are discarded.
        tail = a[th - 8:th, :]
        keep = lax.broadcasted_iota(jnp.int32, tail.shape, 0) >= (8 - rem)
        folded = folded + jnp.where(keep, tail, jnp.zeros_like(tail))
    return folded


def _iou_stats_kernel(x_ref, t_ref, out_ref, acc_ref, *,
                      num_classes, tile_h, h_per_split, height, needs_mask):
    """Accumulates per-class [inter, pred_sum, target_sum] for one (image, row-split).

    x_ref  : (1, C, tile_h, W) logits block (f32/bf16/f16; cast to f32 in-kernel)
    t_ref  : (1, tile_h, W)    integer class-label block
    out_ref: (1, 1, C-1, 3)    stats slab for classes 1..C-1, written at finalize
    acc_ref: (C-1, 3, r, W) f32 vreg-shaped partial sums (r = min(tile_h, 8))
    """
    s = pl.program_id(1)
    h = pl.program_id(2)

    @pl.when(h == 0)
    def _init():
        acc_ref[...] = jnp.zeros_like(acc_ref)

    t = t_ref[0]                                            # (tile_h, W) int

    valid = None
    if needs_mask:
        row0 = (s * h_per_split + h) * tile_h
        rows = lax.broadcasted_iota(jnp.int32, t.shape, 0) + row0
        valid = rows < height
        # Mask labels once: OOB rows get a sentinel class that never matches a
        # foreground class, so inter / target terms drop out via selects.
        t = jnp.where(valid, t, num_classes)

    def logits_f32(c):
        return x_ref[0, c].astype(jnp.float32)

    if num_classes <= _SMALL_C:
        # Memoized per-class exp slabs: fewest EUP ops at small C.
        xs = [logits_f32(c) for c in range(num_classes)]
        m = xs[0]
        for c in range(1, num_classes):
            m = jnp.maximum(m, xs[c])
        es = [jnp.exp(xc - m) for xc in xs]
        denom = es[0]
        for c in range(1, num_classes):
            denom = denom + es[c]
    else:
        # Streaming max/sum bounds live VMEM temporaries at large class counts.
        es = None
        m = logits_f32(0)
        for c in range(1, num_classes):
            m = jnp.maximum(m, logits_f32(c))
        denom = jnp.exp(logits_f32(0) - m)
        for c in range(1, num_classes):
            denom = denom + jnp.exp(logits_f32(c) - m)

    # Softmax denominator on the EUP slot (approx rcp: ~2^-12 relative error).
    inv = pl.reciprocal(denom, approx=True)

    for row, c in enumerate(range(1, num_classes)):         # class 0 = background
        e_c = es[c] if es is not None else jnp.exp(logits_f32(c) - m)
        p_c = e_c * inv                                      # softmax prob of class c
        is_c = t == c                                        # bool one-hot (sentinel-masked)
        inter_c = jnp.where(is_c, p_c, 0.0)                  # select (NaN-safe), no extra mul
        tgt_c = is_c.astype(jnp.float32)
        if valid is not None:
            p_c = jnp.where(valid, p_c, 0.0)                 # discard OOB-row softmax garbage
        acc_ref[row, 0] += _fold_rows(inter_c)               # intersection partials
        acc_ref[row, 1] += _fold_rows(p_c)                   # pred-sum partials
        acc_ref[row, 2] += _fold_rows(tgt_c)                 # target-sum partials

    @pl.when(h == pl.num_programs(2) - 1)
    def _finalize():
        # The only cross-lane/sublane (XLU) reductions and narrow stores: once
        # per (image, split) instead of once per grid step.
        for row in range(num_classes - 1):
            for q in range(3):
                tot = jnp.sum(jnp.sum(acc_ref[row, q], axis=1, keepdims=True),
                              axis=0, keepdims=True)          # (1, 1)
                out_ref[0, 0, row:row + 1, q:q + 1] = tot


@functools.partial(jax.jit, static_argnames=("num_classes", "max_tile_pixels"))
def iou_loss(inputs, targets, num_classes=3, max_tile_pixels=None):
    """Pallas-backed equivalent of IoULoss.forward(inputs, targets, num_classes).

    inputs : (N, C, H, W) float logits (C == num_classes; f32 / bf16 / f16)
    targets: (N, H, W)    integer class labels in [0, num_classes)
    returns scalar float32 loss.
    """
    N, C, H, W = inputs.shape
    assert C == num_classes, "channel dim must equal num_classes"
    assert num_classes >= 2
    assert targets.shape == (N, H, W)

    # No wrapper-side layout / pad passes; only normalize exotic dtypes.
    if (not jnp.issubdtype(inputs.dtype, jnp.floating)
            or jnp.dtype(inputs.dtype).itemsize > 4):
        inputs = inputs.astype(jnp.float32)
    if (not jnp.issubdtype(targets.dtype, jnp.integer)
            or jnp.dtype(targets.dtype).itemsize > 4):
        targets = targets.astype(jnp.int32)
    elif num_classes >= jnp.iinfo(targets.dtype).max:
        targets = targets.astype(jnp.int32)      # sentinel must fit the label dtype

    l_isz = jnp.dtype(inputs.dtype).itemsize
    t_isz = jnp.dtype(targets.dtype).itemsize
    row_g = max(_sublane_tile(inputs.dtype), _sublane_tile(targets.dtype))

    # Tile sizing: double-buffered input blocks plus ~2C+3 f32 elementwise
    # temporaries must fit the working budget (safe even on v7x's 64 MiB VMEM).
    temp_slabs = (2 * num_classes + 3) if num_classes <= _SMALL_C else 6
    bytes_per_pixel = 2 * (num_classes * l_isz + t_isz) + 4 * temp_slabs
    target_pixels = max(8 * 128, _VMEM_WORKING_BUDGET // bytes_per_pixel)
    if max_tile_pixels is not None:
        target_pixels = min(target_pixels, max_tile_pixels)

    tile_h = _pick_tile_h(H, W, row_g, target_pixels)
    total_h_tiles = pl.cdiv(H, tile_h)

    # Second "parallel" grid axis: lets v7x spread one image's row tiles over
    # both TensorCores (free on the single-core v5e / v6e).
    n_split = 2 if total_h_tiles >= 2 else 1
    h_per_split = pl.cdiv(total_h_tiles, n_split)
    needs_mask = (n_split * h_per_split * tile_h) != H
    last_block = total_h_tiles - 1
    fold_rows = min(tile_h, 8)

    kernel = functools.partial(
        _iou_stats_kernel,
        num_classes=num_classes, tile_h=tile_h, h_per_split=h_per_split,
        height=H, needs_mask=needs_mask)

    def x_map(n, s, h):
        # Clamp redundant tiles of an uneven split onto the last real tile; the
        # kernel's validity mask (computed from the unclamped position) zeroes
        # their contribution.
        return (n, 0, jnp.minimum(s * h_per_split + h, last_block), 0)

    def t_map(n, s, h):
        return (n, jnp.minimum(s * h_per_split + h, last_block), 0)

    stats = pl.pallas_call(
        kernel,
        out_shape=jax.ShapeDtypeStruct((N, n_split, num_classes - 1, 3),
                                       jnp.float32),
        grid_spec=pltpu.PrefetchScalarGridSpec(
            num_scalar_prefetch=0,
            grid=(N, n_split, h_per_split),
            in_specs=[
                pl.BlockSpec((1, C, tile_h, W), x_map),
                pl.BlockSpec((1, tile_h, W), t_map),
            ],
            out_specs=pl.BlockSpec((1, 1, num_classes - 1, 3),
                                   lambda n, s, h: (n, s, 0, 0)),
            scratch_shapes=[
                pltpu.VMEM((num_classes - 1, 3, fold_rows, W), jnp.float32)],
        ),
        compiler_params=pltpu.CompilerParams(
            dimension_semantics=("parallel", "parallel", "arbitrary"),
            vmem_limit_bytes=_VMEM_LIMIT_BYTES),
    )(inputs, targets)

    # Tiny scalar epilogue: combine per-(image, split) slabs and form the loss.
    stats = jnp.sum(stats, axis=(0, 1))                     # (num_classes-1, 3)
    inter, psum, tsum = stats[:, 0], stats[:, 1], stats[:, 2]
    iou = inter / (psum + tsum - inter + 1e-07)
    return jnp.sum(1.0 - iou) / (num_classes - 1)


def _reference_loss(inputs, targets, num_classes=3):
    """Pure-JAX reference mirroring the PyTorch forward exactly."""
    pred = jax.nn.softmax(inputs.astype(jnp.float32), axis=1)   # (N, C, H, W)
    tgt = jax.nn.one_hot(targets, num_classes, dtype=jnp.float32)
    tgt = jnp.transpose(tgt, (0, 3, 1, 2))                      # (N, C, H, W)
    loss = 0.0
    for c in range(1, num_classes):
        pc = pred[:, c, :, :]
        tc = tgt[:, c, :, :]
        inter = jnp.sum(pc * tc)
        union = jnp.sum(pc) + jnp.sum(tc) - inter
        loss += 1.0 - inter / (union + 1e-07)
    return loss / (num_classes - 1)


if __name__ == "__main__":
    key = jax.random.PRNGKey(0)

    # Case 1: small NCHW image, f32 logits, int32 labels (single full-height tile).
    nc = 3
    N, H, W = 2, 16, 16
    k1, k2, key = jax.random.split(key, 3)
    x = jax.random.normal(k1, (N, nc, H, W), dtype=jnp.float32)
    t = jax.random.randint(k2, (N, H, W), 0, nc, dtype=jnp.int32)
    out = jax.block_until_ready(iou_loss(x, t, num_classes=nc))
    ref = jax.block_until_ready(_reference_loss(x, t, nc))
    assert jnp.allclose(out, ref, rtol=1e-3, atol=1e-5), (out, ref)

    # Case 2: odd height -> multiple row tiles, 2-way row split, masked tail and a
    # clamped duplicate tile (max_tile_pixels forces tiling at this tiny size).
    nc = 4
    N, H, W = 1, 52, 16
    k1, k2, key = jax.random.split(key, 3)
    x = jax.random.normal(k1, (N, nc, H, W), dtype=jnp.float32)
    t = jax.random.randint(k2, (N, H, W), 0, nc, dtype=jnp.int32)
    out = jax.block_until_ready(
        iou_loss(x, t, num_classes=nc, max_tile_pixels=8 * W))
    ref = jax.block_until_ready(_reference_loss(x, t, nc))
    assert jnp.allclose(out, ref, rtol=1e-3, atol=1e-5), (out, ref)

    # Case 3: bf16 logits + int8 labels (narrow-dtype HBM path, 32-row granularity).
    nc = 3
    N, H, W = 2, 40, 16
    k1, k2, key = jax.random.split(key, 3)
    x = jax.random.normal(k1, (N, nc, H, W), dtype=jnp.float32).astype(jnp.bfloat16)
    t = jax.random.randint(k2, (N, H, W), 0, nc).astype(jnp.int8)
    out = jax.block_until_ready(
        iou_loss(x, t, num_classes=nc, max_tile_pixels=32 * W))
    ref = jax.block_until_ready(_reference_loss(x, t, nc))
    assert jnp.allclose(out, ref, rtol=2e-3, atol=1e-4), (out, ref)

    print("KERNEL_OK")
</pallas_src>

<mosaic_0001>
module attributes {stable_mosaic.version = 11 : i64} {
  func.func @_iou_stats_kernel(%arg0: i32, %arg1: i32, %arg2: i32, %arg3: memref<1x3x16x16xf32, #tpu.memory_space<vmem>>, %arg4: memref<1x16x16xi32, #tpu.memory_space<vmem>>, %arg5: memref<1x1x2x3xf32, #tpu.memory_space<vmem>>, %arg6: memref<2x3x8x16xf32, #tpu.memory_space<vmem>>) attributes {dimension_semantics = [#tpu.dimension_semantics<parallel>, #tpu.dimension_semantics<parallel>, #tpu.dimension_semantics<arbitrary>], iteration_bounds = array<i64: 2, 1, 1>, scalar_prefetch = 0 : i64, scratch_operands = 1 : i64, tpu.core_type = #tpu.core_type<tc>, window_params = [{transform_indices = @transform_0, window_bounds = array<i64: 1, 3, 16, 16>}, {transform_indices = @transform_1, window_bounds = array<i64: 1, 16, 16>}, {transform_indices = @transform_2, window_bounds = array<i64: 1, 1, 2, 3>}]} {
    %c0_i32 = arith.constant 0 : i32
    %0 = arith.cmpi eq, %arg2, %c0_i32 : i32
    %1 = arith.extui %0 : i1 to i32
    %c0_i32_0 = arith.constant 0 : i32
    %2 = arith.cmpi ne, %1, %c0_i32_0 : i32
    scf.if %2 {
      %cst_70 = arith.constant 0.000000e+00 : f32
      %87 = vector.broadcast %cst_70 : f32 to vector<2x3x8x16xf32>
      %c0_71 = arith.constant 0 : index
      %c0_72 = arith.constant 0 : index
      %c0_73 = arith.constant 0 : index
      %c0_74 = arith.constant 0 : index
      %88 = vector.load %arg6[%c0_71, %c0_72, %c0_73, %c0_74] : memref<2x3x8x16xf32, #tpu.memory_space<vmem>>, vector<2x3x8x16xf32>
      tpu.vector_store %arg6[%c0_71, %c0_72, %c0_73, %c0_74], %87 {strides = array<i32>} : memref<2x3x8x16xf32, #tpu.memory_space<vmem>>, vector<2x3x8x16xf32>,
    } else {
    }
    %c0 = arith.constant 0 : index
    %c0_1 = arith.constant 0 : index
    %c0_2 = arith.constant 0 : index
    %3 = vector.load %arg4[%c0, %c0_1, %c0_2] : memref<1x16x16xi32, #tpu.memory_space<vmem>>, vector<1x16x16xi32>
    %4 = vector.shape_cast %3 : vector<1x16x16xi32> to vector<16x16xi32>
    %c0_3 = arith.constant 0 : index
    %c0_4 = arith.constant 0 : index
    %c0_5 = arith.constant 0 : index
    %c0_6 = arith.constant 0 : index
    %5 = vector.load %arg3[%c0_3, %c0_4, %c0_5, %c0_6] : memref<1x3x16x16xf32, #tpu.memory_space<vmem>>, vector<1x1x16x16xf32>
    %6 = vector.shape_cast %5 : vector<1x1x16x16xf32> to vector<16x16xf32>
    %c0_7 = arith.constant 0 : index
    %c1 = arith.constant 1 : index
    %c0_8 = arith.constant 0 : index
    %c0_9 = arith.constant 0 : index
    %7 = vector.load %arg3[%c0_7, %c1, %c0_8, %c0_9] : memref<1x3x16x16xf32, #tpu.memory_space<vmem>>, vector<1x1x16x16xf32>
    %8 = vector.shape_cast %7 : vector<1x1x16x16xf32> to vector<16x16xf32>
    %c0_10 = arith.constant 0 : index
    %c2 = arith.constant 2 : index
    %c0_11 = arith.constant 0 : index
    %c0_12 = arith.constant 0 : index
    %9 = vector.load %arg3[%c0_10, %c2, %c0_11, %c0_12] : memref<1x3x16x16xf32, #tpu.memory_space<vmem>>, vector<1x1x16x16xf32>
    %10 = vector.shape_cast %9 : vector<1x1x16x16xf32> to vector<16x16xf32>
    %11 = arith.maximumf %6, %8 : vector<16x16xf32>
    %12 = arith.maximumf %11, %10 : vector<16x16xf32>
    %13 = arith.subf %6, %12 : vector<16x16xf32>
    %14 = math.exp %13 : vector<16x16xf32>
    %15 = arith.subf %8, %12 : vector<16x16xf32>
    %16 = math.exp %15 : vector<16x16xf32>
    %17 = arith.subf %10, %12 : vector<16x16xf32>
    %18 = math.exp %17 : vector<16x16xf32>
    %19 = arith.addf %14, %16 : vector<16x16xf32>
    %20 = arith.addf %19, %18 : vector<16x16xf32>
    %21 = tpu.reciprocal %20 {approx = true} : vector<16x16xf32> -> vector<16x16xf32>
    %22 = arith.mulf %16, %21 : vector<16x16xf32>
    %c1_i32 = arith.constant 1 : i32
    %23 = vector.broadcast %c1_i32 : i32 to vector<16x16xi32>
    %24 = arith.cmpi eq, %4, %23 : vector<16x16xi32>
    %cst = arith.constant 0.000000e+00 : f32
    %25 = vector.broadcast %cst : f32 to vector<16x16xf32>
    %26 = arith.select %24, %22, %25 : vector<16x16xi1>, vector<16x16xf32>
    %27 = arith.extui %24 : vector<16x16xi1> to vector<16x16xi32>
    %28 = arith.sitofp %27 : vector<16x16xi32> to vector<16x16xf32>
    %c0_13 = arith.constant 0 : index
    %c0_14 = arith.constant 0 : index
    %c0_15 = arith.constant 0 : index
    %c0_16 = arith.constant 0 : index
    %29 = vector.load %arg6[%c0_13, %c0_14, %c0_15, %c0_16] : memref<2x3x8x16xf32, #tpu.memory_space<vmem>>, vector<1x1x8x16xf32>
    %30 = vector.shape_cast %29 : vector<1x1x8x16xf32> to vector<8x16xf32>
    %31 = vector.shape_cast %26 : vector<16x16xf32> to vector<2x8x16xf32>
    %cst_17 = arith.constant dense<0.000000e+00> : vector<8x16xf32>
    %32 = vector.multi_reduction <add>, %31, %cst_17 [0] : vector<2x8x16xf32> to vector<8x16xf32>
    %33 = arith.addf %30, %32 : vector<8x16xf32>
    %c0_18 = arith.constant 0 : index
    %c0_19 = arith.constant 0 : index
    %c0_20 = arith.constant 0 : index
    %c0_21 = arith.constant 0 : index
    %34 = vector.load %arg6[%c0_18, %c0_19, %c0_20, %c0_21] : memref<2x3x8x16xf32, #tpu.memory_space<vmem>>, vector<1x1x8x16xf32>
    %35 = vector.shape_cast %34 : vector<1x1x8x16xf32> to vector<8x16xf32>
    %36 = vector.shape_cast %33 : vector<8x16xf32> to vector<1x1x8x16xf32>
    tpu.vector_store %arg6[%c0_18, %c0_19, %c0_20, %c0_21], %36 {strides = array<i32>} : memref<2x3x8x16xf32, #tpu.memory_space<vmem>>, vector<1x1x8x16xf32>,
    %c0_22 = arith.constant 0 : index
    %c1_23 = arith.constant 1 : index
    %c0_24 = arith.constant 0 : index
    %c0_25 = arith.constant 0 : index
    %37 = vector.load %arg6[%c0_22, %c1_23, %c0_24, %c0_25] : memref<2x3x8x16xf32, #tpu.memory_space<vmem>>, vector<1x1x8x16xf32>
    %38 = vector.shape_cast %37 : vector<1x1x8x16xf32> to vector<8x16xf32>
    %39 = vector.shape_cast %22 : vector<16x16xf32> to vector<2x8x16xf32>
    %cst_26 = arith.constant dense<0.000000e+00> : vector<8x16xf32>
    %40 = vector.multi_reduction <add>, %39, %cst_26 [0] : vector<2x8x16xf32> to vector<8x16xf32>
    %41 = arith.addf %38, %40 : vector<8x16xf32>
    %c0_27 = arith.constant 0 : index
    %c1_28 = arith.constant 1 : index
    %c0_29 = arith.constant 0 : index
    %c0_30 = arith.constant 0 : index
    %42 = vector.load %arg6[%c0_27, %c1_28, %c0_29, %c0_30] : memref<2x3x8x16xf32, #tpu.memory_space<vmem>>, vector<1x1x8x16xf32>
    %43 = vector.shape_cast %42 : vector<1x1x8x16xf32> to vector<8x16xf32>
    %44 = vector.shape_cast %41 : vector<8x16xf32> to vector<1x1x8x16xf32>
    tpu.vector_store %arg6[%c0_27, %c1_28, %c0_29, %c0_30], %44 {strides = array<i32>} : memref<2x3x8x16xf32, #tpu.memory_space<vmem>>, vector<1x1x8x16xf32>,
    %c0_31 = arith.constant 0 : index
    %c2_32 = arith.constant 2 : index
    %c0_33 = arith.constant 0 : index
    %c0_34 = arith.constant 0 : index
    %45 = vector.load %arg6[%c0_31, %c2_32, %c0_33, %c0_34] : memref<2x3x8x16xf32, #tpu.memory_space<vmem>>, vector<1x1x8x16xf32>
    %46 = vector.shape_cast %45 : vector<1x1x8x16xf32> to vector<8x16xf32>
    %47 = vector.shape_cast %28 : vector<16x16xf32> to vector<2x8x16xf32>
    %cst_35 = arith.constant dense<0.000000e+00> : vector<8x16xf32>
    %48 = vector.multi_reduction <add>, %47, %cst_35 [0] : vector<2x8x16xf32> to vector<8x16xf32>
    %49 = arith.addf %46, %48 : vector<8x16xf32>
    %c0_36 = arith.constant 0 : index
    %c2_37 = arith.constant 2 : index
    %c0_38 = arith.constant 0 : index
    %c0_39 = arith.constant 0 : index
    %50 = vector.load %arg6[%c0_36, %c2_37, %c0_38, %c0_39] : memref<2x3x8x16xf32, #tpu.memory_space<vmem>>, vector<1x1x8x16xf32>
    %51 = vector.shape_cast %50 : vector<1x1x8x16xf32> to vector<8x16xf32>
    %52 = vector.shape_cast %49 : vector<8x16xf32> to vector<1x1x8x16xf32>
    tpu.vector_store %arg6[%c0_36, %c2_37, %c0_38, %c0_39], %52 {strides = array<i32>} : memref<2x3x8x16xf32, #tpu.memory_space<vmem>>, vector<1x1x8x16xf32>,
    %53 = arith.mulf %18, %21 : vector<16x16xf32>
    %c2_i32 = arith.constant 2 : i32
    %54 = vector.broadcast %c2_i32 : i32 to vector<16x16xi32>
    %55 = arith.cmpi eq, %4, %54 : vector<16x16xi32>
    %cst_40 = arith.constant 0.000000e+00 : f32
    %56 = vector.broadcast %cst_40 : f32 to vector<16x16xf32>
    %57 = arith.select %55, %53, %56 : vector<16x16xi1>, vector<16x16xf32>
    %58 = arith.extui %55 : vector<16x16xi1> to vector<16x16xi32>
    %59 = arith.sitofp %58 : vector<16x16xi32> to vector<16x16xf32>
    %c1_41 = arith.constant 1 : index
    %c0_42 = arith.constant 0 : index
    %c0_43 = arith.constant 0 : index
    %c0_44 = arith.constant 0 : index
    %60 = vector.load %arg6[%c1_41, %c0_42, %c0_43, %c0_44] : memref<2x3x8x16xf32, #tpu.memory_space<vmem>>, vector<1x1x8x16xf32>
    %61 = vector.shape_cast %60 : vector<1x1x8x16xf32> to vector<8x16xf32>
    %62 = vector.shape_cast %57 : vector<16x16xf32> to vector<2x8x16xf32>
    %cst_45 = arith.constant dense<0.000000e+00> : vector<8x16xf32>
    %63 = vector.multi_reduction <add>, %62, %cst_45 [0] : vector<2x8x16xf32> to vector<8x16xf32>
    %64 = arith.addf %61, %63 : vector<8x16xf32>
    %c1_46 = arith.constant 1 : index
    %c0_47 = arith.constant 0 : index
    %c0_48 = arith.constant 0 : index
    %c0_49 = arith.constant 0 : index
    %65 = vector.load %arg6[%c1_46, %c0_47, %c0_48, %c0_49] : memref<2x3x8x16xf32, #tpu.memory_space<vmem>>, vector<1x1x8x16xf32>
    %66 = vector.shape_cast %65 : vector<1x1x8x16xf32> to vector<8x16xf32>
    %67 = vector.shape_cast %64 : vector<8x16xf32> to vector<1x1x8x16xf32>
    tpu.vector_store %arg6[%c1_46, %c0_47, %c0_48, %c0_49], %67 {strides = array<i32>} : memref<2x3x8x16xf32, #tpu.memory_space<vmem>>, vector<1x1x8x16xf32>,
    %c1_50 = arith.constant 1 : index
    %c1_51 = arith.constant 1 : index
    %c0_52 = arith.constant 0 : index
    %c0_53 = arith.constant 0 : index
    %68 = vector.load %arg6[%c1_50, %c1_51, %c0_52, %c0_53] : memref<2x3x8x16xf32, #tpu.memory_space<vmem>>, vector<1x1x8x16xf32>
    %69 = vector.shape_cast %68 : vector<1x1x8x16xf32> to vector<8x16xf32>
    %70 = vector.shape_cast %53 : vector<16x16xf32> to vector<2x8x16xf32>
    %cst_54 = arith.constant dense<0.000000e+00> : vector<8x16xf32>
    %71 = vector.multi_reduction <add>, %70, %cst_54 [0] : vector<2x8x16xf32> to vector<8x16xf32>
    %72 = arith.addf %69, %71 : vector<8x16xf32>
    %c1_55 = arith.constant 1 : index
    %c1_56 = arith.constant 1 : index
    %c0_57 = arith.constant 0 : index
    %c0_58 = arith.constant 0 : index
    %73 = vector.load %arg6[%c1_55, %c1_56, %c0_57, %c0_58] : memref<2x3x8x16xf32, #tpu.memory_space<vmem>>, vector<1x1x8x16xf32>
    %74 = vector.shape_cast %73 : vector<1x1x8x16xf32> to vector<8x16xf32>
    %75 = vector.shape_cast %72 : vector<8x16xf32> to vector<1x1x8x16xf32>
    tpu.vector_store %arg6[%c1_55, %c1_56, %c0_57, %c0_58], %75 {strides = array<i32>} : memref<2x3x8x16xf32, #tpu.memory_space<vmem>>, vector<1x1x8x16xf32>,
    %c1_59 = arith.constant 1 : index
    %c2_60 = arith.constant 2 : index
    %c0_61 = arith.constant 0 : index
    %c0_62 = arith.constant 0 : index
    %76 = vector.load %arg6[%c1_59, %c2_60, %c0_61, %c0_62] : memref<2x3x8x16xf32, #tpu.memory_space<vmem>>, vector<1x1x8x16xf32>
    %77 = vector.shape_cast %76 : vector<1x1x8x16xf32> to vector<8x16xf32>
    %78 = vector.shape_cast %59 : vector<16x16xf32> to vector<2x8x16xf32>
    %cst_63 = arith.constant dense<0.000000e+00> : vector<8x16xf32>
    %79 = vector.multi_reduction <add>, %78, %cst_63 [0] : vector<2x8x16xf32> to vector<8x16xf32>
    %80 = arith.addf %77, %79 : vector<8x16xf32>
    %c1_64 = arith.constant 1 : index
    %c2_65 = arith.constant 2 : index
    %c0_66 = arith.constant 0 : index
    %c0_67 = arith.constant 0 : index
    %81 = vector.load %arg6[%c1_64, %c2_65, %c0_66, %c0_67] : memref<2x3x8x16xf32, #tpu.memory_space<vmem>>, vector<1x1x8x16xf32>
    %82 = vector.shape_cast %81 : vector<1x1x8x16xf32> to vector<8x16xf32>
    %83 = vector.shape_cast %80 : vector<8x16xf32> to vector<1x1x8x16xf32>
    tpu.vector_store %arg6[%c1_64, %c2_65, %c0_66, %c0_67], %83 {strides = array<i32>} : memref<2x3x8x16xf32, #tpu.memory_space<vmem>>, vector<1x1x8x16xf32>,
    %c0_i32_68 = arith.constant 0 : i32
    %84 = arith.cmpi eq, %arg2, %c0_i32_68 : i32
    %85 = arith.extui %84 : i1 to i32
    %c0_i32_69 = arith.constant 0 : i32
    %86 = arith.cmpi ne, %85, %c0_i32_69 : i32
    scf.if %86 {
      %c0_70 = arith.constant 0 : index
      %c0_71 = arith.constant 0 : index
      %c0_72 = arith.constant 0 : index
      %c0_73 = arith.constant 0 : index
      %87 = vector.load %arg6[%c0_70, %c0_71, %c0_72, %c0_73] : memref<2x3x8x16xf32, #tpu.memory_space<vmem>>, vector<1x1x8x16xf32>
      %88 = vector.shape_cast %87 : vector<1x1x8x16xf32> to vector<8x16xf32>
      %cst_74 = arith.constant dense<0.000000e+00> : vector<8xf32>
      %89 = vector.multi_reduction <add>, %88, %cst_74 [1] : vector<8x16xf32> to vector<8xf32>
      %90 = vector.shape_cast %89 : vector<8xf32> to vector<8x1xf32>
      %cst_75 = arith.constant dense<0.000000e+00> : vector<1xf32>
      %91 = vector.multi_reduction <add>, %90, %cst_75 [0] : vector<8x1xf32> to vector<1xf32>
      %92 = vector.shape_cast %91 : vector<1xf32> to vector<1x1xf32>
      %c0_76 = arith.constant 0 : index
      %c0_77 = arith.constant 0 : index
      %c0_78 = arith.constant 0 : index
      %c0_79 = arith.constant 0 : index
      %93 = vector.load %arg5[%c0_76, %c0_77, %c0_78, %c0_79] : memref<1x1x2x3xf32, #tpu.memory_space<vmem>>, vector<1x1x1x1xf32>
      %94 = vector.shape_cast %93 : vector<1x1x1x1xf32> to vector<1x1xf32>
      %95 = vector.shape_cast %92 : vector<1x1xf32> to vector<1x1x1x1xf32>
      tpu.vector_store %arg5[%c0_76, %c0_77, %c0_78, %c0_79], %95 {strides = array<i32>} : memref<1x1x2x3xf32, #tpu.memory_space<vmem>>, vector<1x1x1x1xf32>,
      %c0_80 = arith.constant 0 : index
      %c1_81 = arith.constant 1 : index
      %c0_82 = arith.constant 0 : index
      %c0_83 = arith.constant 0 : index
      %96 = vector.load %arg6[%c0_80, %c1_81, %c0_82, %c0_83] : memref<2x3x8x16xf32, #tpu.memory_space<vmem>>, vector<1x1x8x16xf32>
      %97 = vector.shape_cast %96 : vector<1x1x8x16xf32> to vector<8x16xf32>
      %cst_84 = arith.constant dense<0.000000e+00> : vector<8xf32>
      %98 = vector.multi_reduction <add>, %97, %cst_84 [1] : vector<8x16xf32> to vector<8xf32>
      %99 = vector.shape_cast %98 : vector<8xf32> to vector<8x1xf32>
      %cst_85 = arith.constant dense<0.000000e+00> : vector<1xf32>
      %100 = vector.multi_reduction <add>, %99, %cst_85 [0] : vector<8x1xf32> to vector<1xf32>
      %101 = vector.shape_cast %100 : vector<1xf32> to vector<1x1xf32>
      %c0_86 = arith.constant 0 : index
      %c0_87 = arith.constant 0 : index
      %c0_88 = arith.constant 0 : index
      %c1_89 = arith.constant 1 : index
      %102 = vector.load %arg5[%c0_86, %c0_87, %c0_88, %c1_89] : memref<1x1x2x3xf32, #tpu.memory_space<vmem>>, vector<1x1x1x1xf32>
      %103 = vector.shape_cast %102 : vector<1x1x1x1xf32> to vector<1x1xf32>
      %104 = vector.shape_cast %101 : vector<1x1xf32> to vector<1x1x1x1xf32>
      tpu.vector_store %arg5[%c0_86, %c0_87, %c0_88, %c1_89], %104 {strides = array<i32>} : memref<1x1x2x3xf32, #tpu.memory_space<vmem>>, vector<1x1x1x1xf32>,
      %c0_90 = arith.constant 0 : index
      %c2_91 = arith.constant 2 : index
      %c0_92 = arith.constant 0 : index
      %c0_93 = arith.constant 0 : index
      %105 = vector.load %arg6[%c0_90, %c2_91, %c0_92, %c0_93] : memref<2x3x8x16xf32, #tpu.memory_space<vmem>>, vector<1x1x8x16xf32>
      %106 = vector.shape_cast %105 : vector<1x1x8x16xf32> to vector<8x16xf32>
      %cst_94 = arith.constant dense<0.000000e+00> : vector<8xf32>
      %107 = vector.multi_reduction <add>, %106, %cst_94 [1] : vector<8x16xf32> to vector<8xf32>
      %108 = vector.shape_cast %107 : vector<8xf32> to vector<8x1xf32>
      %cst_95 = arith.constant dense<0.000000e+00> : vector<1xf32>
      %109 = vector.multi_reduction <add>, %108, %cst_95 [0] : vector<8x1xf32> to vector<1xf32>
      %110 = vector.shape_cast %109 : vector<1xf32> to vector<1x1xf32>
      %c0_96 = arith.constant 0 : index
      %c0_97 = arith.constant 0 : index
      %c0_98 = arith.constant 0 : index
      %c2_99 = arith.constant 2 : index
      %111 = vector.load %arg5[%c0_96, %c0_97, %c0_98, %c2_99] : memref<1x1x2x3xf32, #tpu.memory_space<vmem>>, vector<1x1x1x1xf32>
      %112 = vector.shape_cast %111 : vector<1x1x1x1xf32> to vector<1x1xf32>
      %113 = vector.shape_cast %110 : vector<1x1xf32> to vector<1x1x1x1xf32>
      tpu.vector_store %arg5[%c0_96, %c0_97, %c0_98, %c2_99], %113 {strides = array<i32>} : memref<1x1x2x3xf32, #tpu.memory_space<vmem>>, vector<1x1x1x1xf32>,
      %c1_100 = arith.constant 1 : index
      %c0_101 = arith.constant 0 : index
      %c0_102 = arith.constant 0 : index
      %c0_103 = arith.constant 0 : index
      %114 = vector.load %arg6[%c1_100, %c0_101, %c0_102, %c0_103] : memref<2x3x8x16xf32, #tpu.memory_space<vmem>>, vector<1x1x8x16xf32>
      %115 = vector.shape_cast %114 : vector<1x1x8x16xf32> to vector<8x16xf32>
      %cst_104 = arith.constant dense<0.000000e+00> : vector<8xf32>
      %116 = vector.multi_reduction <add>, %115, %cst_104 [1] : vector<8x16xf32> to vector<8xf32>
      %117 = vector.shape_cast %116 : vector<8xf32> to vector<8x1xf32>
      %cst_105 = arith.constant dense<0.000000e+00> : vector<1xf32>
      %118 = vector.multi_reduction <add>, %117, %cst_105 [0] : vector<8x1xf32> to vector<1xf32>
      %119 = vector.shape_cast %118 : vector<1xf32> to vector<1x1xf32>
      %c0_106 = arith.constant 0 : index
      %c0_107 = arith.constant 0 : index
      %c1_108 = arith.constant 1 : index
      %c0_109 = arith.constant 0 : index
      %120 = vector.load %arg5[%c0_106, %c0_107, %c1_108, %c0_109] : memref<1x1x2x3xf32, #tpu.memory_space<vmem>>, vector<1x1x1x1xf32>
      %121 = vector.shape_cast %120 : vector<1x1x1x1xf32> to vector<1x1xf32>
      %122 = vector.shape_cast %119 : vector<1x1xf32> to vector<1x1x1x1xf32>
      tpu.vector_store %arg5[%c0_106, %c0_107, %c1_108, %c0_109], %122 {strides = array<i32>} : memref<1x1x2x3xf32, #tpu.memory_space<vmem>>, vector<1x1x1x1xf32>,
      %c1_110 = arith.constant 1 : index
      %c1_111 = arith.constant 1 : index
      %c0_112 = arith.constant 0 : index
      %c0_113 = arith.constant 0 : index
      %123 = vector.load %arg6[%c1_110, %c1_111, %c0_112, %c0_113] : memref<2x3x8x16xf32, #tpu.memory_space<vmem>>, vector<1x1x8x16xf32>
      %124 = vector.shape_cast %123 : vector<1x1x8x16xf32> to vector<8x16xf32>
      %cst_114 = arith.constant dense<0.000000e+00> : vector<8xf32>
      %125 = vector.multi_reduction <add>, %124, %cst_114 [1] : vector<8x16xf32> to vector<8xf32>
      %126 = vector.shape_cast %125 : vector<8xf32> to vector<8x1xf32>
      %cst_115 = arith.constant dense<0.000000e+00> : vector<1xf32>
      %127 = vector.multi_reduction <add>, %126, %cst_115 [0] : vector<8x1xf32> to vector<1xf32>
      %128 = vector.shape_cast %127 : vector<1xf32> to vector<1x1xf32>
      %c0_116 = arith.constant 0 : index
      %c0_117 = arith.constant 0 : index
      %c1_118 = arith.constant 1 : index
      %c1_119 = arith.constant 1 : index
      %129 = vector.load %arg5[%c0_116, %c0_117, %c1_118, %c1_119] : memref<1x1x2x3xf32, #tpu.memory_space<vmem>>, vector<1x1x1x1xf32>
      %130 = vector.shape_cast %129 : vector<1x1x1x1xf32> to vector<1x1xf32>
      %131 = vector.shape_cast %128 : vector<1x1xf32> to vector<1x1x1x1xf32>
      tpu.vector_store %arg5[%c0_116, %c0_117, %c1_118, %c1_119], %131 {strides = array<i32>} : memref<1x1x2x3xf32, #tpu.memory_space<vmem>>, vector<1x1x1x1xf32>,
      %c1_120 = arith.constant 1 : index
      %c2_121 = arith.constant 2 : index
      %c0_122 = arith.constant 0 : index
      %c0_123 = arith.constant 0 : index
      %132 = vector.load %arg6[%c1_120, %c2_121, %c0_122, %c0_123] : memref<2x3x8x16xf32, #tpu.memory_space<vmem>>, vector<1x1x8x16xf32>
      %133 = vector.shape_cast %132 : vector<1x1x8x16xf32> to vector<8x16xf32>
      %cst_124 = arith.constant dense<0.000000e+00> : vector<8xf32>
      %134 = vector.multi_reduction <add>, %133, %cst_124 [1] : vector<8x16xf32> to vector<8xf32>
      %135 = vector.shape_cast %134 : vector<8xf32> to vector<8x1xf32>
      %cst_125 = arith.constant dense<0.000000e+00> : vector<1xf32>
      %136 = vector.multi_reduction <add>, %135, %cst_125 [0] : vector<8x1xf32> to vector<1xf32>
      %137 = vector.shape_cast %136 : vector<1xf32> to vector<1x1xf32>
      %c0_126 = arith.constant 0 : index
      %c0_127 = arith.constant 0 : index
      %c1_128 = arith.constant 1 : index
      %c2_129 = arith.constant 2 : index
      %138 = vector.load %arg5[%c0_126, %c0_127, %c1_128, %c2_129] : memref<1x1x2x3xf32, #tpu.memory_space<vmem>>, vector<1x1x1x1xf32>
      %139 = vector.shape_cast %138 : vector<1x1x1x1xf32> to vector<1x1xf32>
      %140 = vector.shape_cast %137 : vector<1x1xf32> to vector<1x1x1x1xf32>
      tpu.vector_store %arg5[%c0_126, %c0_127, %c1_128, %c2_129], %140 {strides = array<i32>} : memref<1x1x2x3xf32, #tpu.memory_space<vmem>>, vector<1x1x1x1xf32>,
    } else {
    }
    return
  }
  func.func @transform_0(%arg0: i32, %arg1: i32, %arg2: i32) -> (i32, i32, i32, i32) {
    %c1_i32 = arith.constant 1 : i32
    %0 = arith.muli %arg1, %c1_i32 : i32
    %1 = arith.addi %0, %arg2 : i32
    %c0_i32 = arith.constant 0 : i32
    %2 = arith.minsi %1, %c0_i32 : i32
    %c0_i32_0 = arith.constant 0 : i32
    %c0_i32_1 = arith.constant 0 : i32
    %c0_i32_2 = arith.constant 0 : i32
    return %arg0, %c0_i32_0, %2, %c0_i32_1 : i32, i32, i32, i32
  }
  func.func @transform_1(%arg0: i32, %arg1: i32, %arg2: i32) -> (i32, i32, i32) {
    %c1_i32 = arith.constant 1 : i32
    %0 = arith.muli %arg1, %c1_i32 : i32
    %1 = arith.addi %0, %arg2 : i32
    %c0_i32 = arith.constant 0 : i32
    %2 = arith.minsi %1, %c0_i32 : i32
    %c0_i32_0 = arith.constant 0 : i32
    %c0_i32_1 = arith.constant 0 : i32
    return %arg0, %2, %c0_i32_0 : i32, i32, i32
  }
  func.func @transform_2(%arg0: i32, %arg1: i32, %arg2: i32) -> (i32, i32, i32, i32) {
    %c0_i32 = arith.constant 0 : i32
    %c0_i32_0 = arith.constant 0 : i32
    %c0_i32_1 = arith.constant 0 : i32
    return %arg0, %arg1, %c0_i32, %c0_i32_0 : i32, i32, i32, i32
  }
}

</mosaic_0001>

<bundles_post_ra>
// kernel: iou_loss.1
= control target key start
LH: loop header
LB: loop body
LE: loop exit
PB: predicated region body
PF: predicated region fallthrough
CT: control target
= control target key end

     0   :  { %7 = vsyncpa [#allocation4], 0  ;;  %s1031_s0 = inlined_call_operand.hbm [shape: f32[2,3,16,16], index: 0, kind: input, shape index: {}]   ;;  %s1032_s1 = inlined_call_operand.hbm [shape: s32[2,16,16], index: 1, kind: input, shape index: {}]   ;;  %s1033_s2 = inlined_call_operand.vmem [shape: f32[2,1,2,3], index: 2, kind: output, shape index: {}]  }
   0x1   :  { %9 = vsyncpa [#allocation4 + $0x1], 0 }
   0x2   :  { %10 = vsyncpa [#allocation6], 0 }
   0x3   :  { %12 = vsyncpa [#allocation6 + $0x1], 0  ;;  %s801_s9 = smov 0   ;;  %s803_s10 = smov 0  }
   0x4   :  { %s805_s11 = smov 0   ;;  %s807_s12 = smov 0  }
   0x5   :  { %s809_s13 = smov 0   ;;  %s811_s14 = smov 0  }
   0x6 LB: > { %s561_s15 = sadd.s32 4294967295, %s779_s14   ;;  %s37_s16 = sadd.s32 1, %s775_s13  ;;  %s779_s14 = sphi %s811_s14, %s18_s14   ;;  %s775_s13 = sphi %s809_s13, %s1043_s13   ;;  %s771_s12 = sphi %s807_s12, %s1042_s12   ;;  %s767_s11 = sphi %s805_s11, %s1041_s11   ;;  %s763_s10 = sphi %s803_s10, %s1040_s10   ;;  %s759_s9 = sphi %s801_s9, %s1039_s9  }
   0x7   : > { %p39_p0 = scmp.ge.s32.totalorder %s37_s16, 2  ;;  %s52_s17 = sadd.s32 1, %s767_s11 }
   0x8   : > { %p59_p1 = scmp.ne.s32.totalorder %s767_s11, %s763_s10  ;;  %p60_p2 = scmp.eq.s32.totalorder %s779_s14, 0 }
   0x9   : > { %s1045_s16 = smov (%p39_p0, %s37_s16), 0  ;;  %p65_p4 = scmp.ne.s32.totalorder %s763_s10, %s759_s9 }
   0xa   : > { %p61_p3 = por %p60_p2, %p59_p1  ;;  %s47_s18 = ssub.s32 %s775_s13, %s1045_s16 }
   0xb   : > { %p66_p5 = scmp.eq.s32.totalorder %s561_s15, 0  ;;  %p50_p6 = scmp.eq.s32.totalorder %s47_s18, 0 }
   0xc   : > { %p597_p8 = scmp.lt.s32.totalorder %s779_s14, 2  ;;  %s849_s21 = sand.u32 1, %s767_s11  }
   0xd   : > { %p840_p7 = por %p66_p5, %p65_p4  ;;  %s584_s22 = smul.u32 768, %s775_s13 }
   0xe   : > { %s846_s20 = scalar_select %p50_p6, %s767_s11, %s52_s17  }
   0xf   : > { %s1035_s19 = scalar_select %p840_p7, 1, 0 }
  0x10   : > { %s583_s23 = smul.u32 48, %s849_s21  ;;  %s856_s26 = scalar_lea.hbm %s1031_s0, %s584_s22 }
  0x11   : > { %p858_p9 = pnand %p597_p8, %p61_p3  ;;  %s152_s30 = scalar_lea.sflag [#allocation4], %s849_s21 }
  0x12   : > { %s155_s28 = scalar_lea.vmem [#allocation3], %s583_s23  ;;  %s665_s3 = scalar_lea.hbm %s856_s26, 768 }
  0x13   : > { %s167_s29 = sshll.u32 %s155_s28, 4  ;;  %p666_p10 = scmp.ne.s32.totalorder %s856_s26, %s665_s3  ;;  %s862_s29 = int_to_ptr.vmem [resolvable:$true] %s167_s29 }
  0x14   : > { %p667_p11 = pneg %p858_p9  ;;  %s670_s6 = scalar_lea.hbm %s1031_s0, 1536 }
  0x15   : > { %p671_p0 = scmp.lt.u32.totalorder %s856_s26, %s1031_s0  ;;  %p672_p1 = scmp.lt.u32.totalorder %s670_s6, %s665_s3 }
  0x16   : > { %p668_p12 = pnand %p667_p11, %p666_p10  ;;  %p674_p3 = scmp.lt.u32.totalorder %s665_s3, %s856_s26 }
  0x17   : > { %p673_p2 = por %p672_p1, %p671_p0 }
  0x18   : > { %p669_p13 = pneg %p668_p12 }
  0x19   : > { %p675_p4 = por %p674_p3, %p673_p2 }
  0x1b   : > { %p676_p5 = pnand %p675_p4, %p669_p13 }
  0x1d   : > { %679 = shalt.err (!%p676_p5)
}
  0x1e   : > { %s680_s9 = scalar_lea.vmem %s862_s29, 768  ;;  %s781_s15 = smov [#allocation3]  }
  0x1f   : > { %p681_p6 = scmp.ne.s32.totalorder %s862_s29, %s680_s9  ;;  %s685_s17 = sshll.u32 %s781_s15, 4  ;;  %s686_s17 = int_to_ptr.vmem [resolvable:$false] %s685_s17 }
  0x20   : > { %s687_s18 = scalar_lea.vmem %s686_s17, 1536  ;;  %p688_p12 = scmp.lt.s32.totalorder %s862_s29, %s686_s17 }
  0x21   : > { %p683_p8 = pnand %p681_p6, %p667_p11  ;;  %p689_p0 = scmp.lt.s32.totalorder %s687_s18, %s680_s9 }
  0x23   : > { %p684_p10 = pneg %p683_p8  ;;  %p690_p1 = por %p689_p0, %p688_p12 }
  0x25   : > { %p691_p2 = pnand %p690_p1, %p684_p10 }
  0x27   : > { %694 = shalt.err (!%p691_p2)
}
  0x28   : > { %s782_s22 = smov 128   ;;  %s783_s23 = smov 8  }
  0x29   : > { %593 = dma.hbm_to_vmem [thread:$0]  (!%p858_p9), %s856_s26, 768, %s862_s29, %s152_s30, %s782_s22, %s782_s22, %s783_s23  }
  0x2a   : > { %p569_p13 = scmp.ge.s32.totalorder %s779_s14, 1  ;;  %p201_p3 = scmp.lt.s32.totalorder %s779_s14, 3 }
  0x2b   : > { %s566_s24 = sshll.u32 %s849_s21, 4  ;;  %s582_s28 = sshll.u32 %s775_s13, 8 }
  0x2c   : > { %p898_p4 = pnand %p569_p13, %p201_p3  ;;  %s181_s3 = scalar_lea.vmem [#allocation5], %s566_s24 }
  0x2d   : > { %s193_s4 = sshll.u32 %s181_s3, 4  ;;  %s906_s7 = scalar_lea.hbm %s1032_s1, %s582_s28  ;;  %s908_s4 = int_to_ptr.vmem [resolvable:$true] %s193_s4 }
  0x2e   : > { %s178_s26 = scalar_lea.sflag [#allocation6], %s849_s21  ;;  %s695_s29 = scalar_lea.hbm %s906_s7, 256 }
  0x2f   : > { %p696_p5 = scmp.ne.s32.totalorder %s906_s7, %s695_s29  ;;  %s700_s9 = scalar_lea.hbm %s1032_s1, 512 }
  0x30   : > { %p701_p10 = scmp.lt.u32.totalorder %s906_s7, %s1032_s1  ;;  %p702_p12 = scmp.lt.u32.totalorder %s700_s9, %s695_s29 }
  0x31   : > { %p698_p6 = pnand %p696_p5, %p667_p11  ;;  %p704_p1 = scmp.lt.u32.totalorder %s695_s29, %s906_s7 }
  0x32   : > { %p703_p0 = por %p702_p12, %p701_p10 }
  0x33   : > { %p699_p8 = pneg %p698_p6 }
  0x34   : > { %p705_p2 = por %p704_p1, %p703_p0 }
  0x36   : > { %p706_p13 = pnand %p705_p2, %p699_p8 }
  0x38   : > { %709 = shalt.err (!%p706_p13)
}
  0x39   : > { %s710_s18 = scalar_lea.vmem %s908_s4, 256  ;;  %s784_s24 = smov [#allocation5]  }
  0x3a   : > { %p711_p3 = scmp.ne.s32.totalorder %s908_s4, %s710_s18  ;;  %s715_s28 = sshll.u32 %s784_s24, 4  ;;  %s716_s28 = int_to_ptr.vmem [resolvable:$false] %s715_s28 }
  0x3b   : > { %s717_s3 = scalar_lea.vmem %s716_s28, 512  ;;  %p718_p7 = scmp.lt.s32.totalorder %s908_s4, %s716_s28 }
  0x3c   : > { %p713_p5 = pnand %p711_p3, %p667_p11  ;;  %p719_p10 = scmp.lt.s32.totalorder %s717_s3, %s710_s18 }
  0x3e   : > { %p714_p6 = pneg %p713_p5  ;;  %p720_p12 = por %p719_p10, %p718_p7 }
  0x40   : > { %p721_p0 = pnand %p720_p12, %p714_p6 }
  0x42   : > { %724 = shalt.err (!%p721_p0)
}
  0x43   : > { %596 = dma.hbm_to_vmem [thread:$0]  (!%p858_p9), %s906_s7, 256, %s908_s4, %s178_s26, %s782_s22, %s782_s22, %s783_s23  }
  0x44   : > { %205 = sbr.rel (%p898_p4) target bundleno = 298 (0x12a), region = 28  ;;  %s207_s5 = sand.u32 (!%p898_p4), 1, %s763_s10  }
  0x45   : > { %s585_s6 = smul.u32 (!%p898_p4), 48, %s207_s5  ;;  %s208_s29 = scalar_lea.sflag (!%p898_p4), [#allocation4], %s207_s5 }
  0x46   : > { %p1038_p7 = scmp.ne.s32.totalorder (!%p898_p4), %s1035_s19, 0 }
  0x47   : > { %s211_s30 = scalar_lea.vmem (!%p898_p4), [#allocation3], %s585_s6 }
  0x4b   : > { %750 = dma.done.wait (%p1038_p7), %s208_s29, 768  }
  0x4c   : > { %752 = vsyncadd (%p1038_p7), %s208_s29, 4294966528  ;;  %s570_s27 = sshll.u32 %s207_s5, 4  ;;  %s217_s21 = scalar_lea.sflag [#allocation6], %s207_s5 }
  0x4d   : > { %s220_s8 = scalar_lea.vmem [#allocation5], %s570_s27 }
  0x4e   : > { %754 = dma.done.wait (%p1038_p7), %s217_s21, 256  }
  0x4f   : > { %756 = vsyncadd (%p1038_p7), %s217_s21, 4294967040  ;;  %vm267_vm0 = vcmask 130048   ;;  %v785_v0 = vmov 0.0   ;;  %v276_v1 = vld [vmem:[%s211_s30] sm:$0xff]  ;;  %v277_v2 = vld [vmem:[%s211_s30 + $0x8] sm:$0xff]  ;;  %p256_p9 = scmp.lt.s32.totalorder %s771_s12, 1 }
  0x50   : > { %269 = vst.msk [vmem:[#allocation2 + $0x8] sm:$0xff] %vm267_vm0, %v785_v0  ;;  %268 = vst.msk [vmem:[#allocation2] sm:$0xff] %vm267_vm0, %v785_v0  ;;  %v572_v3 = vld [vmem:[%s211_s30 + $0x10] sm:$0xff]  ;;  %v573_v4 = vld [vmem:[%s211_s30 + $0x18] sm:$0xff]  ;;  %vm387_vm5 = vcmask 0   ;;  %vm399_vm6 = vcmask 8200  }
  0x51   : > { %270 = vst.msk [vmem:[#allocation2 + $0x10] sm:$0xff] %vm267_vm0, %v785_v0  ;;  %271 = vst.msk [vmem:[#allocation2 + $0x18] sm:$0xff] %vm267_vm0, %v785_v0  ;;  %v574_v5 = vld [vmem:[%s211_s30 + $0x20] sm:$0xff]  ;;  %v575_v6 = vld [vmem:[%s211_s30 + $0x28] sm:$0xff]  ;;  %v284_v7 = vmax.f32 %v276_v1, %v572_v3  ;;  %v285_v8 = vmax.f32 %v277_v2, %v573_v4  ;;  %s1047_s12 = smov (!%p256_p9, %s771_s12), 1  ;;  %vm411_vm7 = vcmask 16400  }
  0x52   : > { %272 = vst.msk [vmem:[#allocation2 + $0x20] sm:$0xff] %vm267_vm0, %v785_v0  ;;  %273 = vst.msk [vmem:[#allocation2 + $0x28] sm:$0xff] %vm267_vm0, %v785_v0  ;;  %v956_v9 = vld [vmem:[%s220_s8] sm:$0xff]  ;;  %v958_v11 = vld [vmem:[%s220_s8 + $0x8] sm:$0xff]  ;;  %s571_s19 = sshll.u32 %s1047_s12, 1 }
  0x53   : > { %v286_v10 = vmax.f32 %v284_v7, %v574_v5  ;;  %vm345_vm1 = vcmp.eq.s32.totalorder %v956_v9, 2  ;;  %v287_v12 = vmax.f32 %v285_v8, %v575_v6  ;;  %vm314_vm2 = vcmp.eq.s32.totalorder %v956_v9, 1  ;;  %s262_s25 = scalar_lea.vmem %s1033_s2, %s571_s19 }
  0x54   : > { %vm346_vm3 = vcmp.eq.s32.totalorder %v958_v11, 2  ;;  %v578_v13 = vsel %vm345_vm1, 1.0, %v785_v0  ;;  %v576_v17 = vsel %vm314_vm2, 1.0, %v785_v0  ;;  %vm315_vm4 = vcmp.eq.s32.totalorder %v958_v11, 1 }
  0x55   : > { %v288_v14 = vsub.f32 %v276_v1, %v286_v10  ;;  %v294_v15 = vsub.f32 %v572_v3, %v286_v10  ;;  %v300_v16 = vsub.f32 %v574_v5, %v286_v10  ;;  %v289_v18 = vsub.f32 %v277_v2, %v287_v12 }
  0x56   : > { %v295_v19 = vsub.f32 %v573_v4, %v287_v12  ;;  %v301_v20 = vsub.f32 %v575_v6, %v287_v12  ;;  %v579_v21 = vsel %vm346_vm3, 1.0, %v785_v0  ;;  %v369_v24 = vsel %vm267_vm0, %v578_v13, 0.0 }
  0x57   : > { %v290_v22 = vmul.f32 1.442695, %v288_v14  ;;  %v296_v23 = vmul.f32 1.442695, %v294_v15  ;;  %v292_v25 = vmul.f32 1.442695, %v289_v18 }
  0x58   : > { %v298_v26 = vmul.f32 1.442695, %v295_v19  ;;  %v302_v27 = vmul.f32 1.442695, %v300_v16  ;;  %v370_v29 = vsel %vm267_vm0, %v579_v21, 0.0  ;;  %v577_v30 = vsel %vm315_vm4, 1.0, %v785_v0 }
  0x59   : > { %649 = vpow2.f32 %v290_v22  ;;  %v368_v28 = vld [vmem:[#allocation2 + $0x28] sm:$0xff]  ;;  %v338_v31 = vsel %vm267_vm0, %v576_v17, 0.0  ;;  %v304_v32 = vmul.f32 1.442695, %v301_v20  ;;  %v371_v33 = vadd.f32 %v370_v29, %v369_v24  ;;  %v337_v34 = vld [vmem:[#allocation2 + $0x10] sm:$0xff]  ;;  %v361_v63 = vld [vmem:[#allocation2 + $0x20] sm:$0xff] }
  0x5a   : > { %651 = vpow2.f32 %v292_v25  ;;  %v339_v35 = vsel %vm267_vm0, %v577_v30, 0.0  ;;  %v330_v59 = vld [vmem:[#allocation2 + $0x8] sm:$0xff]  ;;  %v322_v2 = vld [vmem:[#allocation2] sm:$0xff]  ;;  %v354_v7 = vld [vmem:[#allocation2 + $0x18] sm:$0xff] }
  0x5b   : > { %653 = vpow2.f32 %v296_v23  ;;  %v340_v36 = vadd.f32 %v339_v35, %v338_v31  ;;  %v372_v37 = vadd.f32 %v371_v33, %v368_v28 }
  0x5c   : > { %655 = vpow2.f32 %v298_v26 }
  0x5d   : > { %657 = vpow2.f32 %v302_v27  ;;  %v341_v38 = vadd.f32 %v340_v36, %v337_v34  ;;  %373 = vst.msk [vmem:[#allocation2 + $0x28] sm:$0xff] %vm267_vm0, %v372_v37 }
  0x5e   : > { %659 = vpow2.f32 %v304_v32 }
  0x5f   : > { %342 = vst.msk [vmem:[#allocation2 + $0x10] sm:$0xff] %vm267_vm0, %v341_v38 }
  0x63   : > { %v650_v39 = vpop.eup %649 }
  0x64   : > { %v652_v40 = vpop.eup %651  ;;  %v435_v23 = vld [vmem:[#allocation2 + $0x28] sm:$0xff] }
  0x65   : > { %v654_v41 = vpop.eup %653  ;;  %v436_v25 = vsel %vm267_vm0, %v435_v23, 0.0 }
  0x66   : > { %v656_v42 = vpop.eup %655  ;;  %v306_v43 = vadd.f32 %v654_v41, %v650_v39  ;;  %v401_v24 = vld [vmem:[#allocation2 + $0x10] sm:$0xff] }
  0x67   : > { %v658_v44 = vpop.eup %657  ;;  %v307_v45 = vadd.f32 %v656_v42, %v652_v40  ;;  %v402_v26 = vsel %vm267_vm0, %v401_v24, 0.0 }
  0x68   : > { %v660_v46 = vpop.eup %659  ;;  %v308_v47 = vadd.f32 %v658_v44, %v306_v43 }
  0x69   : > { %v309_v48 = vadd.f32 %v660_v46, %v307_v45 }
  0x6a   : > { %661 = vrcp.f32 %v308_v47 }
  0x6b   : > { %663 = vrcp.f32 %v309_v48 }
  0x74   : > { %v662_v49 = vpop.eup %661 }
  0x75   : > { %v664_v50 = vpop.eup %663  ;;  %v312_v51 = vmul.f32 %v662_v49, %v654_v41  ;;  %v343_v52 = vmul.f32 %v662_v49, %v658_v44 }
  0x76   : > { %v313_v53 = vmul.f32 %v664_v50, %v656_v42  ;;  %v344_v54 = vmul.f32 %v664_v50, %v660_v46 }
  0x77   : > { %v331_v55 = vsel %vm267_vm0, %v312_v51, 0.0  ;;  %v316_v56 = vsel %vm314_vm2, %v312_v51, 0.0  ;;  %v362_v57 = vsel %vm267_vm0, %v343_v52, 0.0  ;;  %v347_v58 = vsel %vm345_vm1, %v343_v52, 0.0 }
  0x78   : > { %v332_v60 = vsel %vm267_vm0, %v313_v53, 0.0  ;;  %v317_v61 = vsel %vm315_vm4, %v313_v53, 0.0  ;;  %v324_v62 = vsel %vm267_vm0, %v316_v56, 0.0  ;;  %v363_v0 = vsel %vm267_vm0, %v344_v54, 0.0 }
  0x79   : > { %v333_v1 = vadd.f32 %v332_v60, %v331_v55  ;;  %v325_v3 = vsel %vm267_vm0, %v317_v61, 0.0  ;;  %v364_v4 = vadd.f32 %v363_v0, %v362_v57  ;;  %v348_v5 = vsel %vm346_vm3, %v344_v54, 0.0 }
  0x7a   : > { %v326_v6 = vadd.f32 %v325_v3, %v324_v62  ;;  %v355_v8 = vsel %vm267_vm0, %v347_v58, 0.0  ;;  %v356_v9 = vsel %vm267_vm0, %v348_v5, 0.0 }
  0x7b   : > { %v334_v10 = vadd.f32 %v333_v1, %v330_v59  ;;  %v365_v12 = vadd.f32 %v364_v4, %v361_v63  ;;  %v357_v13 = vadd.f32 %v356_v9, %v355_v8 }
  0x7c   : > { %v327_v14 = vadd.f32 %v326_v6, %v322_v2 }
  0x7d   : > { %335 = vst.msk [vmem:[#allocation2 + $0x8] sm:$0xff] %vm267_vm0, %v334_v10  ;;  %366 = vst.msk [vmem:[#allocation2 + $0x20] sm:$0xff] %vm267_vm0, %v365_v12  ;;  %v358_v15 = vadd.f32 %v357_v13, %v354_v7 }
  0x7e   : > { %328 = vst.msk [vmem:[#allocation2] sm:$0xff] %vm267_vm0, %v327_v14 }
  0x7f   : > { %359 = vst.msk [vmem:[#allocation2 + $0x18] sm:$0xff] %vm267_vm0, %v358_v15 }
  0x84   : > { %v389_v11 = vld [vmem:[#allocation2 + $0x8] sm:$0xff]  ;;  %v424_v16 = vld [vmem:[#allocation2 + $0x20] sm:$0xff] }
  0x85   : > { %v390_v17 = vsel %vm267_vm0, %v389_v11, 0.0  ;;  %v377_v18 = vld [vmem:[#allocation2] sm:$0xff]  ;;  %v425_v21 = vsel %vm267_vm0, %v424_v16, 0.0 }
  0x86   : > { %391 = vadd.xlane.f32.xlu1 %v390_v17  ;;  %v378_v19 = vsel %vm267_vm0, %v377_v18, 0.0  ;;  %v413_v20 = vld [vmem:[#allocation2 + $0x18] sm:$0xff] }
  0x87   : > { %379 = vadd.xlane.f32.xlu0 %v378_v19  ;;  %v414_v22 = vsel %vm267_vm0, %v413_v20, 0.0 }
  0x8a   : > { %426 = vadd.xlane.f32.xlu1 %v425_v21 }
  0x8b   : > { %415 = vadd.xlane.f32.xlu0 %v414_v22 }
  0x8e   : > { %437 = vadd.xlane.f32.xlu1 %v436_v25 }
  0x8f   : > { %403 = vadd.xlane.f32.xlu0 %v402_v26 }
 0x113   : > { %v392_v27 = vpop.xlane.xlu1 %391 }
 0x114   : > { %v393_v28 = vrot.slane %v392_v27, 4  ;;  %v380_v29 = vpop.xlane.xlu0 %379 }
 0x115   : > { %v381_v30 = vrot.slane %v380_v29, 4 }
 0x116   : > { %v394_v31 = vadd.f32 %v393_v28, %v392_v27 }
 0x117   : > { %v382_v32 = vadd.f32 %v381_v30, %v380_v29  ;;  %v427_v33 = vpop.xlane.xlu1 %426 }
 0x118   : > { %v395_v34 = vrot.slane %v394_v31, 2  ;;  %v428_v35 = vrot.slane %v427_v33, 4  ;;  %v416_v36 = vpop.xlane.xlu0 %415 }
 0x119   : > { %v383_v37 = vrot.slane %v382_v32, 2  ;;  %v417_v38 = vrot.slane %v416_v36, 4 }
 0x11a   : > { %v396_v39 = vadd.f32 %v395_v34, %v394_v31  ;;  %v429_v40 = vadd.f32 %v428_v35, %v427_v33 }
 0x11b   : > { %v384_v41 = vadd.f32 %v383_v37, %v382_v32  ;;  %v418_v42 = vadd.f32 %v417_v38, %v416_v36  ;;  %v438_v43 = vpop.xlane.xlu1 %437 }
 0x11c   : > { %v397_v44 = vrot.slane %v396_v39, 1  ;;  %v430_v45 = vrot.slane %v429_v40, 2  ;;  %v439_v46 = vrot.slane %v438_v43, 4  ;;  %v404_v47 = vpop.xlane.xlu0 %403 }
 0x11d   : > { %v385_v48 = vrot.slane %v384_v41, 1  ;;  %v419_v49 = vrot.slane %v418_v42, 2  ;;  %v405_v50 = vrot.slane %v404_v47, 4 }
 0x11e   : > { %v431_v51 = vadd.f32 %v430_v45, %v429_v40  ;;  %v440_v52 = vadd.f32 %v439_v46, %v438_v43  ;;  %v398_v56 = vadd.f32 %v397_v44, %v396_v39 }
 0x11f   : > { %v386_v53 = vadd.f32 %v385_v48, %v384_v41  ;;  %v420_v54 = vadd.f32 %v419_v49, %v418_v42  ;;  %v406_v55 = vadd.f32 %v405_v50, %v404_v47 }
 0x120   : > { %v432_v57 = vrot.slane %v431_v51, 1  ;;  %v441_v58 = vrot.slane %v440_v52, 2 }
 0x121   : > { %388 = vst.msk [vmem:[%s262_s25] sm:$0x1] %vm387_vm5, %v386_v53  ;;  %v421_v59 = vrot.slane %v420_v54, 1  ;;  %v407_v60 = vrot.slane %v406_v55, 2 }
 0x122   : > { %400 = vst.msk [vmem:[%s262_s25] sm:$0x1] %vm399_vm6, %v398_v56  ;;  %v442_v61 = vadd.f32 %v441_v58, %v440_v52  ;;  %v433_v0 = vadd.f32 %v432_v57, %v431_v51 }
 0x123   : > { %v422_v62 = vadd.f32 %v421_v59, %v420_v54  ;;  %v408_v63 = vadd.f32 %v407_v60, %v406_v55 }
 0x124   : > { %v443_v1 = vrot.slane %v442_v61, 1 }
 0x125   : > { %423 = vst.msk [vmem:[%s262_s25 + $0x1] sm:$0x1] %vm387_vm5, %v422_v62  ;;  %v409_v2 = vrot.slane %v408_v63, 1 }
 0x126   : > { %434 = vst.msk [vmem:[%s262_s25 + $0x1] sm:$0x1] %vm399_vm6, %v433_v0  ;;  %v444_v3 = vadd.f32 %v443_v1, %v442_v61 }
 0x127   : > { %v410_v4 = vadd.f32 %v409_v2, %v408_v63 }
 0x128   : > { %445 = vst.msk [vmem:[%s262_s25 + $0x1] sm:$0x1] %vm411_vm7, %v444_v3 }
 0x129   : > { %412 = vst.msk [vmem:[%s262_s25] sm:$0x1] %vm411_vm7, %v410_v4 }
 0x12a PF: > { %s18_s14 = sadd.s32 1, %s779_s14   ;;  %s1039_s9 = smov %s763_s10 }
 0x12b   : > { %p15_p11 = scmp.ge.s32.totalorder %s18_s14, 4   ;;  %s1040_s10 = smov %s767_s11 }
 0x12c   : > { %s1041_s11 = smov %s846_s20  ;;  %s1042_s12 = smov %s775_s13 }
 0x12d   : > { %s1043_s13 = smov %s1045_s16  ;;  %17 = sbr.rel (!%p15_p11) target bundleno = 6 (0x6), region = 96 }
 0x134   :  { %471 = vsyncpa [#allocation4], 1 }
 0x135   :  { %473 = vsyncpa [#allocation4 + $0x1], 1 }
 0x136   :  { %474 = vsyncpa [#allocation6], 1 }
 0x137   :  { %476 = vsyncpa [#allocation6 + $0x1], 1 }

</bundles_post_ra>
